<compile_context>
chip_gen: v6e
topology: v6e:2x2x1
jax: 0.10.0
libtpu: 0.0.40
codegen_flags: <defaults>
</compile_context>

<pallas_src>
import functools

import jax
import jax.numpy as jnp
from jax.experimental import pallas as pl
from jax.experimental.pallas import tpu as pltpu


def _adapter_kernel(x_ref, w1_ref, w2_ref, w3_ref, o_ref):
    """Fused 3-layer MLP (no bias) with ReLU after every layer.

    x_ref : (tm, c_in_p)       activation tile
    w1_ref: (c_in_p, c_mid_p)  pre-transposed (in, out) layout
    w2_ref: (c_mid_p, c_mid_p)
    w3_ref: (c_mid_p, c_in_p)
    o_ref : (tm, c_in_p)
    """
    cdt = w1_ref.dtype  # compute dtype of the MXU operands (== activation dtype)

    # layer 1: x @ W1t, ReLU (weights consumed as stored -> no in-kernel .T)
    h = jnp.dot(x_ref[...], w1_ref[...], preferred_element_type=jnp.float32)
    h = jnp.maximum(h, 0.0).astype(cdt)

    # layer 2: h @ W2t, ReLU
    h = jnp.dot(h, w2_ref[...], preferred_element_type=jnp.float32)
    h = jnp.maximum(h, 0.0).astype(cdt)

    # layer 3: h @ W3t, ReLU
    y = jnp.dot(h, w3_ref[...], preferred_element_type=jnp.float32)
    y = jnp.maximum(y, 0.0)

    o_ref[...] = y.astype(o_ref.dtype)


def _round_up(x, m):
    return (x + m - 1) // m * m


@functools.partial(jax.jit, static_argnames=("tm",))
def adapters_forward(x, w1, w2, w3, *, tm=256):
    """Apply the Adapters MLP to x (..., c_in) -> (..., c_in).

    w1: (c_mid, c_in), w2: (c_mid, c_mid), w3: (c_in, c_mid)  -- PyTorch
    nn.Linear layout (out_features, in_features); the kernel computes x @ W.T
    by pre-transposing once in this wrapper.
    """
    orig_shape = x.shape
    c_in = orig_shape[-1]
    c_mid = w1.shape[0]
    x2d = x.reshape(-1, c_in)
    n = x2d.shape[0]
    dt = x.dtype
    itemsize = jnp.dtype(dt).itemsize

    # --- feature padding: lane width is 128 -------------------------------
    c_in_p = _round_up(c_in, 128)
    c_mid_p = _round_up(c_mid, 128)

    # --- row tiling: multiple of 16 sublanes (covers f32 & bf16 packing) ---
    sub = 16
    tm_eff = min(tm, _round_up(n, sub))       # don't over-pad tiny inputs
    tm_eff = _round_up(max(tm_eff, sub), sub)
    n_pad = _round_up(n, tm_eff)
    grid = n_pad // tm_eff

    # --- hoist weight transpose / cast / padding out of the kernel --------
    w1t = jnp.zeros((c_in_p, c_mid_p), dt).at[:c_in, :c_mid].set(w1.T.astype(dt))
    w2t = jnp.zeros((c_mid_p, c_mid_p), dt).at[:c_mid, :c_mid].set(w2.T.astype(dt))
    w3t = jnp.zeros((c_mid_p, c_in_p), dt).at[:c_mid, :c_in].set(w3.T.astype(dt))

    xp = jnp.zeros((n_pad, c_in_p), dt).at[:n, :c_in].set(x2d)

    # --- VMEM budget & cost estimate ---------------------------------------
    weight_bytes = (2 * c_in_p * c_mid_p + c_mid_p * c_mid_p) * itemsize
    vmem_bytes = (
        4 * tm_eff * c_in_p * itemsize   # in + out tiles, double-buffered
        + 2 * weight_bytes               # resident weights (+ buffer slack)
        + 2 * tm_eff * c_mid_p * 4       # f32 intermediates
        + (4 << 20))                     # headroom
    vmem_bytes = int(min(vmem_bytes, 96 << 20))

    flops = 2 * n_pad * (2 * c_in_p * c_mid_p + c_mid_p * c_mid_p)
    bytes_accessed = (2 * n_pad * c_in_p) * itemsize + weight_bytes

    out = pl.pallas_call(
        _adapter_kernel,
        out_shape=jax.ShapeDtypeStruct((n_pad, c_in_p), dt),
        grid_spec=pltpu.PrefetchScalarGridSpec(
            num_scalar_prefetch=0,
            grid=(grid,),
            in_specs=[
                # activation rows tiled over the (parallel) grid axis
                pl.BlockSpec((tm_eff, c_in_p), lambda i: (i, 0)),
                # weights: full arrays, constant block index -> fetched once
                pl.BlockSpec((c_in_p, c_mid_p), lambda i: (0, 0)),
                pl.BlockSpec((c_mid_p, c_mid_p), lambda i: (0, 0)),
                pl.BlockSpec((c_mid_p, c_in_p), lambda i: (0, 0)),
            ],
            out_specs=pl.BlockSpec((tm_eff, c_in_p), lambda i: (i, 0)),
        ),
        compiler_params=pltpu.CompilerParams(
            dimension_semantics=("parallel",),
            vmem_limit_bytes=vmem_bytes),
        cost_estimate=pl.CostEstimate(
            flops=int(flops), transcendentals=0,
            bytes_accessed=int(bytes_accessed)),
    )(xp, w1t, w2t, w3t)

    return out[:n, :c_in].reshape(orig_shape)


def init_adapter_params(key, c_in, reduction=4, dtype=jnp.float32):
    """Deterministic weight init matching nn.Linear shapes (out, in)."""
    c_mid = c_in // reduction
    k1, k2, k3 = jax.random.split(key, 3)

    def kaiming_uniform(k, shape):
        fan_in = shape[1]
        bound = (1.0 / fan_in) ** 0.5
        return jax.random.uniform(k, shape, dtype, minval=-bound, maxval=bound)

    w1 = kaiming_uniform(k1, (c_mid, c_in))   # Linear(c_in -> c_mid)
    w2 = kaiming_uniform(k2, (c_mid, c_mid))  # Linear(c_mid -> c_mid)
    w3 = kaiming_uniform(k3, (c_in, c_mid))   # Linear(c_mid -> c_in)
    return w1, w2, w3


def _reference_forward(x, w1, w2, w3):
    """Plain-JAX reference (eval-mode Adapters)."""
    h = jnp.maximum(x @ w1.T, 0.0)
    h = jnp.maximum(h @ w2.T, 0.0)
    return jnp.maximum(h @ w3.T, 0.0)


if __name__ == "__main__":
    key = jax.random.PRNGKey(0)
    kx, kw = jax.random.split(key)

    # small, non-128-aligned shapes to exercise the padding paths
    batch, seq, c_in, reduction = 2, 8, 96, 4
    x = jax.random.normal(kx, (batch, seq, c_in), dtype=jnp.float32)
    w1, w2, w3 = init_adapter_params(kw, c_in, reduction)

    out = adapters_forward(x, w1, w2, w3)
    out = jax.block_until_ready(out)

    ref = _reference_forward(x.reshape(-1, c_in), w1, w2, w3).reshape(x.shape)
    assert out.shape == x.shape
    assert jnp.allclose(out, ref, atol=1e-4, rtol=1e-4), "mismatch vs reference"

    print("KERNEL_OK")
</pallas_src>

<mosaic_0001>
module attributes {stable_mosaic.version = 11 : i64} {
  func.func @_adapter_kernel(%arg0: i32, %arg1: memref<16x128xf32, #tpu.memory_space<vmem>>, %arg2: memref<128x128xf32, #tpu.memory_space<vmem>>, %arg3: memref<128x128xf32, #tpu.memory_space<vmem>>, %arg4: memref<128x128xf32, #tpu.memory_space<vmem>>, %arg5: memref<16x128xf32, #tpu.memory_space<vmem>>) attributes {dimension_semantics = [#tpu.dimension_semantics<parallel>], iteration_bounds = array<i64: 1>, scalar_prefetch = 0 : i64, scratch_operands = 0 : i64, tpu.core_type = #tpu.core_type<tc>, window_params = [{transform_indices = @transform_0, window_bounds = array<i64: 16, 128>}, {pipeline_mode = #tpu.pipeline_mode<synchronous>, transform_indices = @transform_1, window_bounds = array<i64: 128, 128>}, {pipeline_mode = #tpu.pipeline_mode<synchronous>, transform_indices = @transform_2, window_bounds = array<i64: 128, 128>}, {pipeline_mode = #tpu.pipeline_mode<synchronous>, transform_indices = @transform_3, window_bounds = array<i64: 128, 128>}, {transform_indices = @transform_4, window_bounds = array<i64: 16, 128>}]} {
    %c0 = arith.constant 0 : index
    %c0_0 = arith.constant 0 : index
    %0 = vector.load %arg1[%c0, %c0_0] : memref<16x128xf32, #tpu.memory_space<vmem>>, vector<16x128xf32>
    %c0_1 = arith.constant 0 : index
    %c0_2 = arith.constant 0 : index
    %1 = vector.load %arg2[%c0_1, %c0_2] : memref<128x128xf32, #tpu.memory_space<vmem>>, vector<128x128xf32>
    %cst = arith.constant dense<0.000000e+00> : vector<16x128xf32>
    %2 = tpu.matmul %0, %1, %cst {dimension_numbers = #tpu.dot_dimension_numbers<[1], [0], [0], [1], [0, 0, 1, 1], [], []>} : vector<16x128xf32>, vector<128x128xf32>, vector<16x128xf32> -> vector<16x128xf32>
    %cst_3 = arith.constant 0.000000e+00 : f32
    %3 = vector.broadcast %cst_3 : f32 to vector<16x128xf32>
    %4 = arith.maximumf %2, %3 : vector<16x128xf32>
    %c0_4 = arith.constant 0 : index
    %c0_5 = arith.constant 0 : index
    %5 = vector.load %arg3[%c0_4, %c0_5] : memref<128x128xf32, #tpu.memory_space<vmem>>, vector<128x128xf32>
    %cst_6 = arith.constant dense<0.000000e+00> : vector<16x128xf32>
    %6 = tpu.matmul %4, %5, %cst_6 {dimension_numbers = #tpu.dot_dimension_numbers<[1], [0], [0], [1], [0, 0, 1, 1], [], []>} : vector<16x128xf32>, vector<128x128xf32>, vector<16x128xf32> -> vector<16x128xf32>
    %cst_7 = arith.constant 0.000000e+00 : f32
    %7 = vector.broadcast %cst_7 : f32 to vector<16x128xf32>
    %8 = arith.maximumf %6, %7 : vector<16x128xf32>
    %c0_8 = arith.constant 0 : index
    %c0_9 = arith.constant 0 : index
    %9 = vector.load %arg4[%c0_8, %c0_9] : memref<128x128xf32, #tpu.memory_space<vmem>>, vector<128x128xf32>
    %cst_10 = arith.constant dense<0.000000e+00> : vector<16x128xf32>
    %10 = tpu.matmul %8, %9, %cst_10 {dimension_numbers = #tpu.dot_dimension_numbers<[1], [0], [0], [1], [0, 0, 1, 1], [], []>} : vector<16x128xf32>, vector<128x128xf32>, vector<16x128xf32> -> vector<16x128xf32>
    %cst_11 = arith.constant 0.000000e+00 : f32
    %11 = vector.broadcast %cst_11 : f32 to vector<16x128xf32>
    %12 = arith.maximumf %10, %11 : vector<16x128xf32>
    %c0_12 = arith.constant 0 : index
    %c0_13 = arith.constant 0 : index
    %13 = vector.load %arg5[%c0_12, %c0_13] : memref<16x128xf32, #tpu.memory_space<vmem>>, vector<16x128xf32>
    tpu.vector_store %arg5[%c0_12, %c0_13], %12 {strides = array<i32>} : memref<16x128xf32, #tpu.memory_space<vmem>>, vector<16x128xf32>,
    return
  }
  func.func @transform_0(%arg0: i32) -> (i32, i32) {
    %c0_i32 = arith.constant 0 : i32
    %c0_i32_0 = arith.constant 0 : i32
    return %arg0, %c0_i32 : i32, i32
  }
  func.func @transform_1(%arg0: i32) -> (i32, i32) {
    %c0_i32 = arith.constant 0 : i32
    %c0_i32_0 = arith.constant 0 : i32
    %c0_i32_1 = arith.constant 0 : i32
    return %c0_i32, %c0_i32_0 : i32, i32
  }
  func.func @transform_2(%arg0: i32) -> (i32, i32) {
    %c0_i32 = arith.constant 0 : i32
    %c0_i32_0 = arith.constant 0 : i32
    %c0_i32_1 = arith.constant 0 : i32
    return %c0_i32, %c0_i32_0 : i32, i32
  }
  func.func @transform_3(%arg0: i32) -> (i32, i32) {
    %c0_i32 = arith.constant 0 : i32
    %c0_i32_0 = arith.constant 0 : i32
    %c0_i32_1 = arith.constant 0 : i32
    return %c0_i32, %c0_i32_0 : i32, i32
  }
  func.func @transform_4(%arg0: i32) -> (i32, i32) {
    %c0_i32 = arith.constant 0 : i32
    %c0_i32_0 = arith.constant 0 : i32
    return %arg0, %c0_i32 : i32, i32
  }
}

</mosaic_0001>

<bundles_post_ra>
// kernel: adapters_forward.1
= control target key start
LH: loop header
LB: loop body
LE: loop exit
PB: predicated region body
PF: predicated region fallthrough
CT: control target
= control target key end

     0   :  { %s644_s1 = inlined_call_operand.vmem [shape: f32[128,128], index: 1, kind: input, shape index: {}]   ;;  %s645_s0 = inlined_call_operand.vmem [shape: f32[16,128], index: 0, kind: input, shape index: {}]   ;;  %s646_s2 = inlined_call_operand.vmem [shape: f32[128,128], index: 2, kind: input, shape index: {}]   ;;  %s647_s3 = inlined_call_operand.vmem [shape: f32[128,128], index: 3, kind: input, shape index: {}]   ;;  %s648_s4 = inlined_call_operand.vmem [shape: f32[16,128], index: 4, kind: output, shape index: {}]  }
   0x1   :  { %v34_v0 = vld [vmem:[%s644_s1 + $0x78] sm:$0xff]  ;;  %v33_v1 = vld [vmem:[%s644_s1 + $0x70] sm:$0xff]  ;;  %v32_v2 = vld [vmem:[%s644_s1 + $0x68] sm:$0xff] }
   0x2   :  { %358 = vmatprep.subr.mxu0 %v34_v0  ;;  %v31_v3 = vld [vmem:[%s644_s1 + $0x60] sm:$0xff]  ;;  %v30_v5 = vld [vmem:[%s644_s1 + $0x58] sm:$0xff]  ;;  %v126_v7 = vld [vmem:[%s646_s2 + $0x70] sm:$0xff] }
   0x3   :  { %359 = vmatpush3.msra.mxu0 %v34_v0  ;;  %v17_v4 = vld [vmem:[%s645_s0] sm:$0xff]  ;;  %v127_v6 = vld [vmem:[%s646_s2 + $0x78] sm:$0xff]  ;;  %v29_v8 = vld [vmem:[%s644_s1 + $0x50] sm:$0xff] }
   0x4   :  { %360 = vmatprep.subr.mxu0 %v33_v1  ;;  %390 = vmatprep.mubr.f32.mxu0 %v17_v4  ;;  %v125_v9 = vld [vmem:[%s646_s2 + $0x68] sm:$0xff]  ;;  %v124_v11 = vld [vmem:[%s646_s2 + $0x60] sm:$0xff]  ;;  %v123_v13 = vld [vmem:[%s646_s2 + $0x58] sm:$0xff] }
   0x5   :  { %361 = vmatpush3.msra.mxu0 %v33_v1  ;;  %393 = vmatprep.subr.mxu1 %v127_v6  ;;  %v28_v10 = vld [vmem:[%s644_s1 + $0x48] sm:$0xff]  ;;  %v27_v12 = vld [vmem:[%s644_s1 + $0x40] sm:$0xff]  ;;  %v26_v14 = vld [vmem:[%s644_s1 + $0x38] sm:$0xff] }
   0x6   :  { %362 = vmatprep.subr.mxu0 %v32_v2  ;;  %394 = vmatpush3.msra.mxu1 %v127_v6  ;;  %v122_v15 = vld [vmem:[%s646_s2 + $0x50] sm:$0xff]  ;;  %v121_v17 = vld [vmem:[%s646_s2 + $0x48] sm:$0xff]  ;;  %v120_v19 = vld [vmem:[%s646_s2 + $0x40] sm:$0xff] }
   0x7   :  { %363 = vmatpush3.msra.mxu0 %v32_v2  ;;  %395 = vmatprep.subr.mxu1 %v126_v7  ;;  %v25_v16 = vld [vmem:[%s644_s1 + $0x30] sm:$0xff]  ;;  %v24_v18 = vld [vmem:[%s644_s1 + $0x28] sm:$0xff]  ;;  %v23_v20 = vld [vmem:[%s644_s1 + $0x20] sm:$0xff] }
   0x8   :  { %364 = vmatprep.subr.mxu0 %v31_v3  ;;  %396 = vmatpush3.msra.mxu1 %v126_v7  ;;  %v119_v21 = vld [vmem:[%s646_s2 + $0x38] sm:$0xff]  ;;  %v118_v23 = vld [vmem:[%s646_s2 + $0x30] sm:$0xff]  ;;  %v117_v25 = vld [vmem:[%s646_s2 + $0x28] sm:$0xff] }
   0x9   :  { %365 = vmatpush3.msra.mxu0 %v31_v3  ;;  %397 = vmatprep.subr.mxu1 %v125_v9  ;;  %v22_v22 = vld [vmem:[%s644_s1 + $0x18] sm:$0xff]  ;;  %v21_v24 = vld [vmem:[%s644_s1 + $0x10] sm:$0xff]  ;;  %v20_v26 = vld [vmem:[%s644_s1 + $0x8] sm:$0xff] }
   0xa   :  { %366 = vmatprep.subr.mxu0 %v30_v5  ;;  %398 = vmatpush3.msra.mxu1 %v125_v9  ;;  %v116_v27 = vld [vmem:[%s646_s2 + $0x20] sm:$0xff]  ;;  %v115_v29 = vld [vmem:[%s646_s2 + $0x18] sm:$0xff]  ;;  %v18_v30 = vld [vmem:[%s645_s0 + $0x8] sm:$0xff] }
   0xb   :  { %367 = vmatpush3.msra.mxu0 %v30_v5  ;;  %399 = vmatprep.subr.mxu1 %v124_v11  ;;  %v19_v28 = vld [vmem:[%s644_s1] sm:$0xff]  ;;  %v114_v31 = vld [vmem:[%s646_s2 + $0x10] sm:$0xff]  ;;  %v113_v32 = vld [vmem:[%s646_s2 + $0x8] sm:$0xff] }
   0xc   :  { %368 = vmatprep.subr.mxu0 %v29_v8  ;;  %400 = vmatpush3.msra.mxu1 %v124_v11  ;;  %v112_v33 = vld [vmem:[%s646_s2] sm:$0xff]  ;;  %v220_v34 = vld [vmem:[%s647_s3 + $0x78] sm:$0xff]  ;;  %v219_v35 = vld [vmem:[%s647_s3 + $0x70] sm:$0xff] }
   0xd   :  { %369 = vmatpush3.msra.mxu0 %v29_v8  ;;  %401 = vmatprep.subr.mxu1 %v123_v13  ;;  %v218_v36 = vld [vmem:[%s647_s3 + $0x68] sm:$0xff]  ;;  %v217_v37 = vld [vmem:[%s647_s3 + $0x60] sm:$0xff]  ;;  %v216_v38 = vld [vmem:[%s647_s3 + $0x58] sm:$0xff] }
   0xe   :  { %370 = vmatprep.subr.mxu0 %v28_v10  ;;  %402 = vmatpush3.msra.mxu1 %v123_v13  ;;  %v215_v39 = vld [vmem:[%s647_s3 + $0x50] sm:$0xff]  ;;  %v214_v40 = vld [vmem:[%s647_s3 + $0x48] sm:$0xff]  ;;  %v213_v41 = vld [vmem:[%s647_s3 + $0x40] sm:$0xff] }
   0xf   :  { %371 = vmatpush3.msra.mxu0 %v28_v10  ;;  %403 = vmatprep.subr.mxu1 %v122_v15  ;;  %v212_v42 = vld [vmem:[%s647_s3 + $0x38] sm:$0xff]  ;;  %v211_v43 = vld [vmem:[%s647_s3 + $0x30] sm:$0xff]  ;;  %v210_v44 = vld [vmem:[%s647_s3 + $0x28] sm:$0xff] }
  0x10   :  { %372 = vmatprep.subr.mxu0 %v27_v12  ;;  %404 = vmatpush3.msra.mxu1 %v122_v15  ;;  %v209_v45 = vld [vmem:[%s647_s3 + $0x20] sm:$0xff]  ;;  %v208_v46 = vld [vmem:[%s647_s3 + $0x18] sm:$0xff]  ;;  %v207_v51 = vld [vmem:[%s647_s3 + $0x10] sm:$0xff] }
  0x11   :  { %373 = vmatpush3.msra.mxu0 %v27_v12  ;;  %405 = vmatprep.subr.mxu1 %v121_v17  ;;  %v206_v52 = vld [vmem:[%s647_s3 + $0x8] sm:$0xff]  ;;  %v205_v53 = vld [vmem:[%s647_s3] sm:$0xff] }
  0x12   :  { %374 = vmatprep.subr.mxu0 %v26_v14  ;;  %406 = vmatpush3.msra.mxu1 %v121_v17 }
  0x13   :  { %375 = vmatpush3.msra.mxu0 %v26_v14  ;;  %407 = vmatprep.subr.mxu1 %v120_v19 }
  0x14   :  { %376 = vmatprep.subr.mxu0 %v25_v16  ;;  %408 = vmatpush3.msra.mxu1 %v120_v19 }
  0x15   :  { %377 = vmatpush3.msra.mxu0 %v25_v16  ;;  %409 = vmatprep.subr.mxu1 %v119_v21 }
  0x16   :  { %378 = vmatprep.subr.mxu0 %v24_v18  ;;  %410 = vmatpush3.msra.mxu1 %v119_v21 }
  0x17   :  { %379 = vmatpush3.msra.mxu0 %v24_v18  ;;  %411 = vmatprep.subr.mxu1 %v118_v23 }
  0x18   :  { %380 = vmatprep.subr.mxu0 %v23_v20  ;;  %412 = vmatpush3.msra.mxu1 %v118_v23 }
  0x19   :  { %381 = vmatpush3.msra.mxu0 %v23_v20  ;;  %413 = vmatprep.subr.mxu1 %v117_v25 }
  0x1a   :  { %382 = vmatprep.subr.mxu0 %v22_v22  ;;  %414 = vmatpush3.msra.mxu1 %v117_v25 }
  0x1b   :  { %383 = vmatpush3.msra.mxu0 %v22_v22  ;;  %415 = vmatprep.subr.mxu1 %v116_v27 }
  0x1c   :  { %384 = vmatprep.subr.mxu0 %v21_v24  ;;  %416 = vmatpush3.msra.mxu1 %v116_v27 }
  0x1d   :  { %385 = vmatpush3.msra.mxu0 %v21_v24  ;;  %417 = vmatprep.subr.mxu1 %v115_v29 }
  0x1e   :  { %386 = vmatprep.subr.mxu0 %v20_v26  ;;  %418 = vmatpush3.msra.mxu1 %v115_v29 }
  0x1f   :  { %387 = vmatpush3.msra.mxu0 %v20_v26  ;;  %419 = vmatprep.subr.mxu1 %v114_v31 }
  0x20   :  { %388 = vmatprep.subr.mxu0 %v19_v28  ;;  %420 = vmatpush3.msra.mxu1 %v114_v31 }
  0x21   :  { %389 = vmatpush3.msra.mxu0 %v19_v28  ;;  %421 = vmatprep.subr.mxu1 %v113_v32 }
  0x22   :  { %391 = vmatmul.mubr.f32.vlgmr.msra.gmra.mxu0 %v18_v30  ;;  %422 = vmatpush3.msra.mxu1 %v113_v32 }
  0x23   :  { %423 = vmatprep.subr.mxu1 %v112_v33  ;;  %428 = vmatprep.subr.mxu0 %v220_v34 }
  0x24   :  { %424 = vmatpush3.msra.mxu1 %v112_v33  ;;  %429 = vmatpush3.msra.mxu0 %v220_v34 }
  0x25   :  { %430 = vmatprep.subr.mxu0 %v219_v35 }
  0x26   :  { %431 = vmatpush3.msra.mxu0 %v219_v35 }
  0x27   :  { %432 = vmatprep.subr.mxu0 %v218_v36 }
  0x28   :  { %433 = vmatpush3.msra.mxu0 %v218_v36 }
  0x29   :  { %434 = vmatprep.subr.mxu0 %v217_v37 }
  0x2a   :  { %435 = vmatpush3.msra.mxu0 %v217_v37 }
  0x2b   :  { %436 = vmatprep.subr.mxu0 %v216_v38 }
  0x2c   :  { %437 = vmatpush3.msra.mxu0 %v216_v38 }
  0x2d   :  { %438 = vmatprep.subr.mxu0 %v215_v39 }
  0x2e   :  { %439 = vmatpush3.msra.mxu0 %v215_v39 }
  0x2f   :  { %440 = vmatprep.subr.mxu0 %v214_v40 }
  0x30   :  { %441 = vmatpush3.msra.mxu0 %v214_v40 }
  0x31   :  { %442 = vmatprep.subr.mxu0 %v213_v41 }
  0x32   :  { %443 = vmatpush3.msra.mxu0 %v213_v41 }
  0x33   :  { %444 = vmatprep.subr.mxu0 %v212_v42 }
  0x34   :  { %445 = vmatpush3.msra.mxu0 %v212_v42 }
  0x35   :  { %446 = vmatprep.subr.mxu0 %v211_v43 }
  0x36   :  { %447 = vmatpush3.msra.mxu0 %v211_v43 }
  0x37   :  { %448 = vmatprep.subr.mxu0 %v210_v44 }
  0x38   :  { %449 = vmatpush3.msra.mxu0 %v210_v44 }
  0x39   :  { %450 = vmatprep.subr.mxu0 %v209_v45 }
  0x3a   :  { %451 = vmatpush3.msra.mxu0 %v209_v45 }
  0x3b   :  { %452 = vmatprep.subr.mxu0 %v208_v46 }
  0x3c   :  { %453 = vmatpush3.msra.mxu0 %v208_v46 }
  0x3d   :  { %454 = vmatprep.subr.mxu0 %v207_v51 }
  0x3e   :  { %455 = vmatpush3.msra.mxu0 %v207_v51 }
  0x3f   :  { %456 = vmatprep.subr.mxu0 %v206_v52 }
  0x40   :  { %457 = vmatpush3.msra.mxu0 %v206_v52 }
  0x41   :  { %458 = vmatprep.subr.mxu0 %v205_v53 }
  0x42   :  { %459 = vmatpush3.msra.mxu0 %v205_v53 }
  0xe2   :  { %v392_v47 = vpop.f32.mrf.mxu0 }
  0xe3   :  { %v111_v50 = vmax.f32 %v392_v47, 0.0 }
  0xe4   :  { %v101_v48 = vpop.f32.mrf.mxu0 }
  0xe5   :  { %v110_v49 = vmax.f32 %v101_v48, 0.0 }
  0xe7   :  { %425 = vmatprep.mubr.f32.mxu1 %v110_v49 }
  0xe8   :  { %426 = vmatmul.mubr.f32.vlgmr.msra.gmra.mxu1 %v111_v50 }
 0x1a8   :  { %v427_v54 = vpop.f32.mrf.mxu1 }
 0x1a9   :  { %v204_v57 = vmax.f32 %v427_v54, 0.0 }
 0x1aa   :  { %v194_v55 = vpop.f32.mrf.mxu1 }
 0x1ab   :  { %v203_v56 = vmax.f32 %v194_v55, 0.0 }
 0x1ad   :  { %460 = vmatprep.mubr.f32.mxu0 %v203_v56 }
 0x1ae   :  { %461 = vmatmul.mubr.f32.vlgmr.msra.gmra.mxu0 %v204_v57 }
 0x26e   :  { %v462_v58 = vpop.f32.mrf.mxu0 }
 0x26f   :  { %v297_v59 = vmax.f32 %v462_v58, 0.0 }
 0x270   :  { %v287_v60 = vpop.f32.mrf.mxu0 }
 0x271   :  { %299 = vst [vmem:[%s648_s4 + $0x8] sm:$0xff] %v297_v59  ;;  %v296_v61 = vmax.f32 %v287_v60, 0.0 }
 0x273   :  { %298 = vst [vmem:[%s648_s4] sm:$0xff] %v296_v61 }

</bundles_post_ra>
